<compile_context>
chip_gen: v7x
topology: tpu7x:2x2x1
jax: 0.10.0
libtpu: 0.0.40
codegen_flags: <defaults>
</compile_context>

<pallas_src>
import jax
import jax.numpy as jnp
from jax import lax
from jax.experimental import pallas as pl
from jax.experimental.pallas import tpu as pltpu

HIDDEN = 64
INPUT = 1
OUTPUT = 3
LANES = 128  # f32 lane width; FC output padded to this for an unmasked store


def _lstm_fc_kernel(x_ref, wih_ref, b_ref, whh_ref, wfc_ref, bfc_ref, out_ref):
    """Whole-sequence LSTM recurrence + final FC in one kernel invocation.

    x_ref  : (T, B, 1)  f32   time-major input (I == 1)
    wih_ref: (1, 4H)    f32   W_ih^T row, g-gate columns pre-scaled by 2
    b_ref  : (1, 4H)    f32   b_ih + b_hh, g-gate columns pre-scaled by 2
    whh_ref: (H, 4H)    bf16  W_hh^T, g-gate columns pre-scaled by 2
    wfc_ref: (H, 128)   bf16  W_fc^T zero-padded to 128 lanes
    bfc_ref: (1, 128)   f32   b_fc zero-padded to 128 lanes
    out_ref: (B, 128)   f32   FC output (first OUTPUT lanes valid)
    """
    H = HIDDEN
    T, B, _ = x_ref.shape

    # Loop-invariant operand loads hoisted out of the recurrence.
    wih = wih_ref[...]
    b = b_ref[...]
    whh = whh_ref[...]

    def step(t, carry):
        h, c = carry
        # Input projection: with I == 1 this is a broadcast mul+add (VPU) with
        # no recurrent dependency, so it overlaps with the previous step.
        gx = x_ref[t] * wih + b                                    # (B, 4H)
        # TODO(synk): keep W_hh resident in the MXU weight registers across steps
        # (pltpu.matmul_push_rhs / matmul_acc_lhs / matmul_pop) to remove the
        # per-step RHS push from the serial h->h path.
        gates = gx + jnp.dot(h.astype(jnp.bfloat16), whh,
                             preferred_element_type=jnp.float32)   # (B, 4H)
        # One full-width sigmoid over all four gates: the g-gate arguments carry
        # the factor 2, so tanh(z) = 2*sigmoid(2z) - 1 comes out of the same pass.
        s = jax.nn.sigmoid(gates)
        i_g = s[:, 0 * H:1 * H]
        f_g = s[:, 1 * H:2 * H]
        g_g = 2.0 * s[:, 2 * H:3 * H] - 1.0                        # tanh(z_g)
        o_g = s[:, 3 * H:4 * H]
        c_new = f_g * c + i_g * g_g
        h_new = o_g * (2.0 * jax.nn.sigmoid(2.0 * c_new) - 1.0)    # o * tanh(c)
        return h_new, c_new

    h0 = jnp.zeros((B, H), jnp.float32)
    c0 = jnp.zeros((B, H), jnp.float32)
    # Capped unroll: lets the scheduler overlap step t's MXU push with step t-1's
    # EUP/VPU gate math without exploding instruction memory for long T.
    h_last, _ = lax.fori_loop(0, T, step, (h0, c0), unroll=min(T, 8))

    # fc(h_T): lane-dense (B, 128) store; wrapper slices the first OUTPUT lanes.
    out_ref[...] = (jnp.dot(h_last.astype(jnp.bfloat16), wfc_ref[...],
                            preferred_element_type=jnp.float32)
                    + bfc_ref[...]).astype(out_ref.dtype)


def prepare_params(params):
    """One-time parameter re-layout (would be done offline in deployment)."""
    H, O = HIDDEN, OUTPUT
    # Pre-scale the g-gate block by 2 so tanh fuses into the single sigmoid pass.
    scale = jnp.ones((4 * H,), jnp.float32).at[2 * H:3 * H].set(2.0)
    wih = params["w_ih"].astype(jnp.float32).T * scale                   # (1, 4H)
    b = ((params["b_ih"] + params["b_hh"]).astype(jnp.float32)
         * scale).reshape(1, 4 * H)                                      # (1, 4H)
    whh = (params["w_hh"].astype(jnp.float32).T * scale).astype(jnp.bfloat16)
    wfc = jnp.zeros((H, LANES), jnp.bfloat16).at[:, :O].set(
        params["w_fc"].astype(jnp.bfloat16).T)                           # (H, 128)
    bfc = jnp.zeros((1, LANES), jnp.float32).at[0, :O].set(
        params["b_fc"].astype(jnp.float32))                              # (1, 128)
    return {"wih": wih, "b": b, "whh": whh, "wfc": wfc, "bfc": bfc}


def posture_rnn_forward(x, prepped):
    """x: (B, T, I) float32, batch_first (PyTorch layout). Returns (B, OUTPUT)."""
    B, T, I = x.shape
    assert I == INPUT
    x_tm = jnp.transpose(x.astype(jnp.float32), (1, 0, 2))               # (T, B, 1)

    # TODO(synk): for very long sequences (T >~ 8K) tile the time axis (grid or
    # pltpu.emit_pipeline with h/c in VMEM scratch across an "arbitrary" axis) so
    # x streams through VMEM instead of being fully resident (v7x 64 MiB budget).
    # NOTE: at larger batch (B >= 16) add a leading "parallel" grid axis over
    # batch tiles so v7x's two TensorCores each run an independent shard.
    out_p = pl.pallas_call(
        _lstm_fc_kernel,
        out_shape=jax.ShapeDtypeStruct((B, LANES), jnp.float32),
        in_specs=[pl.BlockSpec(memory_space=pltpu.MemorySpace.VMEM)] * 6,
        out_specs=pl.BlockSpec(memory_space=pltpu.MemorySpace.VMEM),
    )(x_tm, prepped["wih"], prepped["b"], prepped["whh"],
      prepped["wfc"], prepped["bfc"])

    return out_p[:, :OUTPUT]


def init_params(key, input_size=INPUT, hidden_size=HIDDEN, output_size=OUTPUT):
    """Deterministic synthetic parameters with PyTorch-style shapes."""
    k = jax.random.split(key, 6)
    s_lstm = 1.0 / jnp.sqrt(hidden_size)
    s_fc = 1.0 / jnp.sqrt(hidden_size)
    return {
        "w_ih": jax.random.uniform(k[0], (4 * hidden_size, input_size),
                                   jnp.float32, -s_lstm, s_lstm),
        "w_hh": jax.random.uniform(k[1], (4 * hidden_size, hidden_size),
                                   jnp.float32, -s_lstm, s_lstm),
        "b_ih": jax.random.uniform(k[2], (4 * hidden_size,),
                                   jnp.float32, -s_lstm, s_lstm),
        "b_hh": jax.random.uniform(k[3], (4 * hidden_size,),
                                   jnp.float32, -s_lstm, s_lstm),
        "w_fc": jax.random.uniform(k[4], (output_size, hidden_size),
                                   jnp.float32, -s_fc, s_fc),
        "b_fc": jax.random.uniform(k[5], (output_size,),
                                   jnp.float32, -s_fc, s_fc),
    }


def _reference_forward(x, params):
    """Pure-JAX f32 reference of the PyTorch forward (for correctness check)."""
    B, T, I = x.shape
    H = HIDDEN
    h = jnp.zeros((B, H), jnp.float32)
    c = jnp.zeros((B, H), jnp.float32)
    wih_t = params["w_ih"].T
    whh_t = params["w_hh"].T
    b = params["b_ih"] + params["b_hh"]
    for t in range(T):
        g = x[:, t, :] @ wih_t + h @ whh_t + b
        i = jax.nn.sigmoid(g[:, 0 * H:1 * H])
        f = jax.nn.sigmoid(g[:, 1 * H:2 * H])
        gg = jnp.tanh(g[:, 2 * H:3 * H])
        o = jax.nn.sigmoid(g[:, 3 * H:4 * H])
        c = f * c + i * gg
        h = o * jnp.tanh(c)
    return h @ params["w_fc"].T + params["b_fc"]


if __name__ == "__main__":
    key = jax.random.PRNGKey(0)
    kx, kp = jax.random.split(key)

    B, T, I = 2, 8, INPUT
    x = jax.random.normal(kx, (B, T, I), jnp.float32)
    params = init_params(kp)

    prepped = prepare_params(params)
    fwd = jax.jit(posture_rnn_forward)
    out = jax.block_until_ready(fwd(x, prepped))

    ref = _reference_forward(x, params)
    assert out.shape == (B, OUTPUT)
    # bf16 MXU operands (f32 accumulation) and the tanh(x) = 2*sigmoid(2x) - 1
    # rewrite give small, expected deviations from the pure-f32 reference.
    assert jnp.allclose(out, ref, atol=1e-2, rtol=1e-2), (out, ref)

    print("KERNEL_OK")
</pallas_src>

<mosaic_0001>
module attributes {stable_mosaic.version = 11 : i64} {
  func.func @_lstm_fc_kernel(%arg0: memref<8x2x1xf32, #tpu.memory_space<vmem>>, %arg1: memref<1x256xf32, #tpu.memory_space<vmem>>, %arg2: memref<1x256xf32, #tpu.memory_space<vmem>>, %arg3: memref<64x256xbf16, #tpu.memory_space<vmem>>, %arg4: memref<64x128xbf16, #tpu.memory_space<vmem>>, %arg5: memref<1x128xf32, #tpu.memory_space<vmem>>, %arg6: memref<2x128xf32, #tpu.memory_space<vmem>>) attributes {dimension_semantics = [], scalar_prefetch = 0 : i64, scratch_operands = 0 : i64, tpu.core_type = #tpu.core_type<tc>} {
    %c0 = arith.constant 0 : index
    %c0_0 = arith.constant 0 : index
    %0 = vector.load %arg1[%c0, %c0_0] : memref<1x256xf32, #tpu.memory_space<vmem>>, vector<1x256xf32>
    %c0_1 = arith.constant 0 : index
    %c0_2 = arith.constant 0 : index
    %1 = vector.load %arg2[%c0_1, %c0_2] : memref<1x256xf32, #tpu.memory_space<vmem>>, vector<1x256xf32>
    %c0_3 = arith.constant 0 : index
    %c0_4 = arith.constant 0 : index
    %2 = vector.load %arg3[%c0_3, %c0_4] : memref<64x256xbf16, #tpu.memory_space<vmem>>, vector<64x256xbf16>
    %cst = arith.constant 0.000000e+00 : f32
    %3 = vector.broadcast %cst : f32 to vector<2x64xf32>
    %cst_5 = arith.constant 0.000000e+00 : f32
    %4 = vector.broadcast %cst_5 : f32 to vector<2x64xf32>
    %c0_i32 = arith.constant 0 : i32
    %5 = arith.index_cast %c0_i32 : i32 to index
    %c0_6 = arith.constant 0 : index
    %c0_7 = arith.constant 0 : index
    %6 = vector.load %arg0[%5, %c0_6, %c0_7] : memref<8x2x1xf32, #tpu.memory_space<vmem>>, vector<1x2x1xf32>
    %7 = vector.shape_cast %6 : vector<1x2x1xf32> to vector<2x1xf32>
    %8 = vector.broadcast %7 : vector<2x1xf32> to vector<2x256xf32>
    %9 = vector.broadcast %0 : vector<1x256xf32> to vector<2x256xf32>
    %10 = arith.mulf %8, %9 : vector<2x256xf32>
    %11 = vector.broadcast %1 : vector<1x256xf32> to vector<2x256xf32>
    %12 = arith.addf %10, %11 : vector<2x256xf32>
    %13 = arith.truncf %3 : vector<2x64xf32> to vector<2x64xbf16>
    %cst_8 = arith.constant dense<0.000000e+00> : vector<2x256xf32>
    %14 = tpu.matmul %13, %2, %cst_8 {dimension_numbers = #tpu.dot_dimension_numbers<[1], [0], [0], [1], [0, 0, 1, 1], [], []>} : vector<2x64xbf16>, vector<64x256xbf16>, vector<2x256xf32> -> vector<2x256xf32>
    %15 = arith.addf %12, %14 : vector<2x256xf32>
    %16 = arith.negf %15 : vector<2x256xf32>
    %17 = math.exp %16 : vector<2x256xf32>
    %cst_9 = arith.constant 1.000000e+00 : f32
    %18 = vector.broadcast %cst_9 : f32 to vector<2x256xf32>
    %19 = arith.addf %18, %17 : vector<2x256xf32>
    %20 = arith.divf %18, %19 : vector<2x256xf32>
    %21 = vector.extract_strided_slice %20 {offsets = [0, 0], sizes = [2, 64], strides = [1, 1]} : vector<2x256xf32> to vector<2x64xf32>
    %22 = vector.extract_strided_slice %20 {offsets = [0, 64], sizes = [2, 64], strides = [1, 1]} : vector<2x256xf32> to vector<2x64xf32>
    %23 = vector.extract_strided_slice %20 {offsets = [0, 128], sizes = [2, 64], strides = [1, 1]} : vector<2x256xf32> to vector<2x64xf32>
    %cst_10 = arith.constant 2.000000e+00 : f32
    %24 = vector.broadcast %cst_10 : f32 to vector<2x64xf32>
    %25 = arith.mulf %24, %23 : vector<2x64xf32>
    %cst_11 = arith.constant 1.000000e+00 : f32
    %26 = vector.broadcast %cst_11 : f32 to vector<2x64xf32>
    %27 = arith.subf %25, %26 : vector<2x64xf32>
    %28 = vector.extract_strided_slice %20 {offsets = [0, 192], sizes = [2, 64], strides = [1, 1]} : vector<2x256xf32> to vector<2x64xf32>
    %29 = arith.mulf %22, %4 : vector<2x64xf32>
    %30 = arith.mulf %21, %27 : vector<2x64xf32>
    %31 = arith.addf %29, %30 : vector<2x64xf32>
    %cst_12 = arith.constant 2.000000e+00 : f32
    %32 = vector.broadcast %cst_12 : f32 to vector<2x64xf32>
    %33 = arith.mulf %32, %31 : vector<2x64xf32>
    %34 = arith.negf %33 : vector<2x64xf32>
    %35 = math.exp %34 : vector<2x64xf32>
    %cst_13 = arith.constant 1.000000e+00 : f32
    %36 = vector.broadcast %cst_13 : f32 to vector<2x64xf32>
    %37 = arith.addf %36, %35 : vector<2x64xf32>
    %38 = arith.divf %36, %37 : vector<2x64xf32>
    %cst_14 = arith.constant 2.000000e+00 : f32
    %39 = vector.broadcast %cst_14 : f32 to vector<2x64xf32>
    %40 = arith.mulf %39, %38 : vector<2x64xf32>
    %cst_15 = arith.constant 1.000000e+00 : f32
    %41 = vector.broadcast %cst_15 : f32 to vector<2x64xf32>
    %42 = arith.subf %40, %41 : vector<2x64xf32>
    %43 = arith.mulf %28, %42 : vector<2x64xf32>
    %c1_i32 = arith.constant 1 : i32
    %44 = arith.index_cast %c1_i32 : i32 to index
    %c0_16 = arith.constant 0 : index
    %c0_17 = arith.constant 0 : index
    %45 = vector.load %arg0[%44, %c0_16, %c0_17] : memref<8x2x1xf32, #tpu.memory_space<vmem>>, vector<1x2x1xf32>
    %46 = vector.shape_cast %45 : vector<1x2x1xf32> to vector<2x1xf32>
    %47 = vector.broadcast %46 : vector<2x1xf32> to vector<2x256xf32>
    %48 = vector.broadcast %0 : vector<1x256xf32> to vector<2x256xf32>
    %49 = arith.mulf %47, %48 : vector<2x256xf32>
    %50 = vector.broadcast %1 : vector<1x256xf32> to vector<2x256xf32>
    %51 = arith.addf %49, %50 : vector<2x256xf32>
    %52 = arith.truncf %43 : vector<2x64xf32> to vector<2x64xbf16>
    %cst_18 = arith.constant dense<0.000000e+00> : vector<2x256xf32>
    %53 = tpu.matmul %52, %2, %cst_18 {dimension_numbers = #tpu.dot_dimension_numbers<[1], [0], [0], [1], [0, 0, 1, 1], [], []>} : vector<2x64xbf16>, vector<64x256xbf16>, vector<2x256xf32> -> vector<2x256xf32>
    %54 = arith.addf %51, %53 : vector<2x256xf32>
    %55 = arith.negf %54 : vector<2x256xf32>
    %56 = math.exp %55 : vector<2x256xf32>
    %cst_19 = arith.constant 1.000000e+00 : f32
    %57 = vector.broadcast %cst_19 : f32 to vector<2x256xf32>
    %58 = arith.addf %57, %56 : vector<2x256xf32>
    %59 = arith.divf %57, %58 : vector<2x256xf32>
    %60 = vector.extract_strided_slice %59 {offsets = [0, 0], sizes = [2, 64], strides = [1, 1]} : vector<2x256xf32> to vector<2x64xf32>
    %61 = vector.extract_strided_slice %59 {offsets = [0, 64], sizes = [2, 64], strides = [1, 1]} : vector<2x256xf32> to vector<2x64xf32>
    %62 = vector.extract_strided_slice %59 {offsets = [0, 128], sizes = [2, 64], strides = [1, 1]} : vector<2x256xf32> to vector<2x64xf32>
    %cst_20 = arith.constant 2.000000e+00 : f32
    %63 = vector.broadcast %cst_20 : f32 to vector<2x64xf32>
    %64 = arith.mulf %63, %62 : vector<2x64xf32>
    %cst_21 = arith.constant 1.000000e+00 : f32
    %65 = vector.broadcast %cst_21 : f32 to vector<2x64xf32>
    %66 = arith.subf %64, %65 : vector<2x64xf32>
    %67 = vector.extract_strided_slice %59 {offsets = [0, 192], sizes = [2, 64], strides = [1, 1]} : vector<2x256xf32> to vector<2x64xf32>
    %68 = arith.mulf %61, %31 : vector<2x64xf32>
    %69 = arith.mulf %60, %66 : vector<2x64xf32>
    %70 = arith.addf %68, %69 : vector<2x64xf32>
    %cst_22 = arith.constant 2.000000e+00 : f32
    %71 = vector.broadcast %cst_22 : f32 to vector<2x64xf32>
    %72 = arith.mulf %71, %70 : vector<2x64xf32>
    %73 = arith.negf %72 : vector<2x64xf32>
    %74 = math.exp %73 : vector<2x64xf32>
    %cst_23 = arith.constant 1.000000e+00 : f32
    %75 = vector.broadcast %cst_23 : f32 to vector<2x64xf32>
    %76 = arith.addf %75, %74 : vector<2x64xf32>
    %77 = arith.divf %75, %76 : vector<2x64xf32>
    %cst_24 = arith.constant 2.000000e+00 : f32
    %78 = vector.broadcast %cst_24 : f32 to vector<2x64xf32>
    %79 = arith.mulf %78, %77 : vector<2x64xf32>
    %cst_25 = arith.constant 1.000000e+00 : f32
    %80 = vector.broadcast %cst_25 : f32 to vector<2x64xf32>
    %81 = arith.subf %79, %80 : vector<2x64xf32>
    %82 = arith.mulf %67, %81 : vector<2x64xf32>
    %c2_i32 = arith.constant 2 : i32
    %83 = arith.index_cast %c2_i32 : i32 to index
    %c0_26 = arith.constant 0 : index
    %c0_27 = arith.constant 0 : index
    %84 = vector.load %arg0[%83, %c0_26, %c0_27] : memref<8x2x1xf32, #tpu.memory_space<vmem>>, vector<1x2x1xf32>
    %85 = vector.shape_cast %84 : vector<1x2x1xf32> to vector<2x1xf32>
    %86 = vector.broadcast %85 : vector<2x1xf32> to vector<2x256xf32>
    %87 = vector.broadcast %0 : vector<1x256xf32> to vector<2x256xf32>
    %88 = arith.mulf %86, %87 : vector<2x256xf32>
    %89 = vector.broadcast %1 : vector<1x256xf32> to vector<2x256xf32>
    %90 = arith.addf %88, %89 : vector<2x256xf32>
    %91 = arith.truncf %82 : vector<2x64xf32> to vector<2x64xbf16>
    %cst_28 = arith.constant dense<0.000000e+00> : vector<2x256xf32>
    %92 = tpu.matmul %91, %2, %cst_28 {dimension_numbers = #tpu.dot_dimension_numbers<[1], [0], [0], [1], [0, 0, 1, 1], [], []>} : vector<2x64xbf16>, vector<64x256xbf16>, vector<2x256xf32> -> vector<2x256xf32>
    %93 = arith.addf %90, %92 : vector<2x256xf32>
    %94 = arith.negf %93 : vector<2x256xf32>
    %95 = math.exp %94 : vector<2x256xf32>
    %cst_29 = arith.constant 1.000000e+00 : f32
    %96 = vector.broadcast %cst_29 : f32 to vector<2x256xf32>
    %97 = arith.addf %96, %95 : vector<2x256xf32>
    %98 = arith.divf %96, %97 : vector<2x256xf32>
    %99 = vector.extract_strided_slice %98 {offsets = [0, 0], sizes = [2, 64], strides = [1, 1]} : vector<2x256xf32> to vector<2x64xf32>
    %100 = vector.extract_strided_slice %98 {offsets = [0, 64], sizes = [2, 64], strides = [1, 1]} : vector<2x256xf32> to vector<2x64xf32>
    %101 = vector.extract_strided_slice %98 {offsets = [0, 128], sizes = [2, 64], strides = [1, 1]} : vector<2x256xf32> to vector<2x64xf32>
    %cst_30 = arith.constant 2.000000e+00 : f32
    %102 = vector.broadcast %cst_30 : f32 to vector<2x64xf32>
    %103 = arith.mulf %102, %101 : vector<2x64xf32>
    %cst_31 = arith.constant 1.000000e+00 : f32
    %104 = vector.broadcast %cst_31 : f32 to vector<2x64xf32>
    %105 = arith.subf %103, %104 : vector<2x64xf32>
    %106 = vector.extract_strided_slice %98 {offsets = [0, 192], sizes = [2, 64], strides = [1, 1]} : vector<2x256xf32> to vector<2x64xf32>
    %107 = arith.mulf %100, %70 : vector<2x64xf32>
    %108 = arith.mulf %99, %105 : vector<2x64xf32>
    %109 = arith.addf %107, %108 : vector<2x64xf32>
    %cst_32 = arith.constant 2.000000e+00 : f32
    %110 = vector.broadcast %cst_32 : f32 to vector<2x64xf32>
    %111 = arith.mulf %110, %109 : vector<2x64xf32>
    %112 = arith.negf %111 : vector<2x64xf32>
    %113 = math.exp %112 : vector<2x64xf32>
    %cst_33 = arith.constant 1.000000e+00 : f32
    %114 = vector.broadcast %cst_33 : f32 to vector<2x64xf32>
    %115 = arith.addf %114, %113 : vector<2x64xf32>
    %116 = arith.divf %114, %115 : vector<2x64xf32>
    %cst_34 = arith.constant 2.000000e+00 : f32
    %117 = vector.broadcast %cst_34 : f32 to vector<2x64xf32>
    %118 = arith.mulf %117, %116 : vector<2x64xf32>
    %cst_35 = arith.constant 1.000000e+00 : f32
    %119 = vector.broadcast %cst_35 : f32 to vector<2x64xf32>
    %120 = arith.subf %118, %119 : vector<2x64xf32>
    %121 = arith.mulf %106, %120 : vector<2x64xf32>
    %c3_i32 = arith.constant 3 : i32
    %122 = arith.index_cast %c3_i32 : i32 to index
    %c0_36 = arith.constant 0 : index
    %c0_37 = arith.constant 0 : index
    %123 = vector.load %arg0[%122, %c0_36, %c0_37] : memref<8x2x1xf32, #tpu.memory_space<vmem>>, vector<1x2x1xf32>
    %124 = vector.shape_cast %123 : vector<1x2x1xf32> to vector<2x1xf32>
    %125 = vector.broadcast %124 : vector<2x1xf32> to vector<2x256xf32>
    %126 = vector.broadcast %0 : vector<1x256xf32> to vector<2x256xf32>
    %127 = arith.mulf %125, %126 : vector<2x256xf32>
    %128 = vector.broadcast %1 : vector<1x256xf32> to vector<2x256xf32>
    %129 = arith.addf %127, %128 : vector<2x256xf32>
    %130 = arith.truncf %121 : vector<2x64xf32> to vector<2x64xbf16>
    %cst_38 = arith.constant dense<0.000000e+00> : vector<2x256xf32>
    %131 = tpu.matmul %130, %2, %cst_38 {dimension_numbers = #tpu.dot_dimension_numbers<[1], [0], [0], [1], [0, 0, 1, 1], [], []>} : vector<2x64xbf16>, vector<64x256xbf16>, vector<2x256xf32> -> vector<2x256xf32>
    %132 = arith.addf %129, %131 : vector<2x256xf32>
    %133 = arith.negf %132 : vector<2x256xf32>
    %134 = math.exp %133 : vector<2x256xf32>
    %cst_39 = arith.constant 1.000000e+00 : f32
    %135 = vector.broadcast %cst_39 : f32 to vector<2x256xf32>
    %136 = arith.addf %135, %134 : vector<2x256xf32>
    %137 = arith.divf %135, %136 : vector<2x256xf32>
    %138 = vector.extract_strided_slice %137 {offsets = [0, 0], sizes = [2, 64], strides = [1, 1]} : vector<2x256xf32> to vector<2x64xf32>
    %139 = vector.extract_strided_slice %137 {offsets = [0, 64], sizes = [2, 64], strides = [1, 1]} : vector<2x256xf32> to vector<2x64xf32>
    %140 = vector.extract_strided_slice %137 {offsets = [0, 128], sizes = [2, 64], strides = [1, 1]} : vector<2x256xf32> to vector<2x64xf32>
    %cst_40 = arith.constant 2.000000e+00 : f32
    %141 = vector.broadcast %cst_40 : f32 to vector<2x64xf32>
    %142 = arith.mulf %141, %140 : vector<2x64xf32>
    %cst_41 = arith.constant 1.000000e+00 : f32
    %143 = vector.broadcast %cst_41 : f32 to vector<2x64xf32>
    %144 = arith.subf %142, %143 : vector<2x64xf32>
    %145 = vector.extract_strided_slice %137 {offsets = [0, 192], sizes = [2, 64], strides = [1, 1]} : vector<2x256xf32> to vector<2x64xf32>
    %146 = arith.mulf %139, %109 : vector<2x64xf32>
    %147 = arith.mulf %138, %144 : vector<2x64xf32>
    %148 = arith.addf %146, %147 : vector<2x64xf32>
    %cst_42 = arith.constant 2.000000e+00 : f32
    %149 = vector.broadcast %cst_42 : f32 to vector<2x64xf32>
    %150 = arith.mulf %149, %148 : vector<2x64xf32>
    %151 = arith.negf %150 : vector<2x64xf32>
    %152 = math.exp %151 : vector<2x64xf32>
    %cst_43 = arith.constant 1.000000e+00 : f32
    %153 = vector.broadcast %cst_43 : f32 to vector<2x64xf32>
    %154 = arith.addf %153, %152 : vector<2x64xf32>
    %155 = arith.divf %153, %154 : vector<2x64xf32>
    %cst_44 = arith.constant 2.000000e+00 : f32
    %156 = vector.broadcast %cst_44 : f32 to vector<2x64xf32>
    %157 = arith.mulf %156, %155 : vector<2x64xf32>
    %cst_45 = arith.constant 1.000000e+00 : f32
    %158 = vector.broadcast %cst_45 : f32 to vector<2x64xf32>
    %159 = arith.subf %157, %158 : vector<2x64xf32>
    %160 = arith.mulf %145, %159 : vector<2x64xf32>
    %c4_i32 = arith.constant 4 : i32
    %161 = arith.index_cast %c4_i32 : i32 to index
    %c0_46 = arith.constant 0 : index
    %c0_47 = arith.constant 0 : index
    %162 = vector.load %arg0[%161, %c0_46, %c0_47] : memref<8x2x1xf32, #tpu.memory_space<vmem>>, vector<1x2x1xf32>
    %163 = vector.shape_cast %162 : vector<1x2x1xf32> to vector<2x1xf32>
    %164 = vector.broadcast %163 : vector<2x1xf32> to vector<2x256xf32>
    %165 = vector.broadcast %0 : vector<1x256xf32> to vector<2x256xf32>
    %166 = arith.mulf %164, %165 : vector<2x256xf32>
    %167 = vector.broadcast %1 : vector<1x256xf32> to vector<2x256xf32>
    %168 = arith.addf %166, %167 : vector<2x256xf32>
    %169 = arith.truncf %160 : vector<2x64xf32> to vector<2x64xbf16>
    %cst_48 = arith.constant dense<0.000000e+00> : vector<2x256xf32>
    %170 = tpu.matmul %169, %2, %cst_48 {dimension_numbers = #tpu.dot_dimension_numbers<[1], [0], [0], [1], [0, 0, 1, 1], [], []>} : vector<2x64xbf16>, vector<64x256xbf16>, vector<2x256xf32> -> vector<2x256xf32>
    %171 = arith.addf %168, %170 : vector<2x256xf32>
    %172 = arith.negf %171 : vector<2x256xf32>
    %173 = math.exp %172 : vector<2x256xf32>
    %cst_49 = arith.constant 1.000000e+00 : f32
    %174 = vector.broadcast %cst_49 : f32 to vector<2x256xf32>
    %175 = arith.addf %174, %173 : vector<2x256xf32>
    %176 = arith.divf %174, %175 : vector<2x256xf32>
    %177 = vector.extract_strided_slice %176 {offsets = [0, 0], sizes = [2, 64], strides = [1, 1]} : vector<2x256xf32> to vector<2x64xf32>
    %178 = vector.extract_strided_slice %176 {offsets = [0, 64], sizes = [2, 64], strides = [1, 1]} : vector<2x256xf32> to vector<2x64xf32>
    %179 = vector.extract_strided_slice %176 {offsets = [0, 128], sizes = [2, 64], strides = [1, 1]} : vector<2x256xf32> to vector<2x64xf32>
    %cst_50 = arith.constant 2.000000e+00 : f32
    %180 = vector.broadcast %cst_50 : f32 to vector<2x64xf32>
    %181 = arith.mulf %180, %179 : vector<2x64xf32>
    %cst_51 = arith.constant 1.000000e+00 : f32
    %182 = vector.broadcast %cst_51 : f32 to vector<2x64xf32>
    %183 = arith.subf %181, %182 : vector<2x64xf32>
    %184 = vector.extract_strided_slice %176 {offsets = [0, 192], sizes = [2, 64], strides = [1, 1]} : vector<2x256xf32> to vector<2x64xf32>
    %185 = arith.mulf %178, %148 : vector<2x64xf32>
    %186 = arith.mulf %177, %183 : vector<2x64xf32>
    %187 = arith.addf %185, %186 : vector<2x64xf32>
    %cst_52 = arith.constant 2.000000e+00 : f32
    %188 = vector.broadcast %cst_52 : f32 to vector<2x64xf32>
    %189 = arith.mulf %188, %187 : vector<2x64xf32>
    %190 = arith.negf %189 : vector<2x64xf32>
    %191 = math.exp %190 : vector<2x64xf32>
    %cst_53 = arith.constant 1.000000e+00 : f32
    %192 = vector.broadcast %cst_53 : f32 to vector<2x64xf32>
    %193 = arith.addf %192, %191 : vector<2x64xf32>
    %194 = arith.divf %192, %193 : vector<2x64xf32>
    %cst_54 = arith.constant 2.000000e+00 : f32
    %195 = vector.broadcast %cst_54 : f32 to vector<2x64xf32>
    %196 = arith.mulf %195, %194 : vector<2x64xf32>
    %cst_55 = arith.constant 1.000000e+00 : f32
    %197 = vector.broadcast %cst_55 : f32 to vector<2x64xf32>
    %198 = arith.subf %196, %197 : vector<2x64xf32>
    %199 = arith.mulf %184, %198 : vector<2x64xf32>
    %c5_i32 = arith.constant 5 : i32
    %200 = arith.index_cast %c5_i32 : i32 to index
    %c0_56 = arith.constant 0 : index
    %c0_57 = arith.constant 0 : index
    %201 = vector.load %arg0[%200, %c0_56, %c0_57] : memref<8x2x1xf32, #tpu.memory_space<vmem>>, vector<1x2x1xf32>
    %202 = vector.shape_cast %201 : vector<1x2x1xf32> to vector<2x1xf32>
    %203 = vector.broadcast %202 : vector<2x1xf32> to vector<2x256xf32>
    %204 = vector.broadcast %0 : vector<1x256xf32> to vector<2x256xf32>
    %205 = arith.mulf %203, %204 : vector<2x256xf32>
    %206 = vector.broadcast %1 : vector<1x256xf32> to vector<2x256xf32>
    %207 = arith.addf %205, %206 : vector<2x256xf32>
    %208 = arith.truncf %199 : vector<2x64xf32> to vector<2x64xbf16>
    %cst_58 = arith.constant dense<0.000000e+00> : vector<2x256xf32>
    %209 = tpu.matmul %208, %2, %cst_58 {dimension_numbers = #tpu.dot_dimension_numbers<[1], [0], [0], [1], [0, 0, 1, 1], [], []>} : vector<2x64xbf16>, vector<64x256xbf16>, vector<2x256xf32> -> vector<2x256xf32>
    %210 = arith.addf %207, %209 : vector<2x256xf32>
    %211 = arith.negf %210 : vector<2x256xf32>
    %212 = math.exp %211 : vector<2x256xf32>
    %cst_59 = arith.constant 1.000000e+00 : f32
    %213 = vector.broadcast %cst_59 : f32 to vector<2x256xf32>
    %214 = arith.addf %213, %212 : vector<2x256xf32>
    %215 = arith.divf %213, %214 : vector<2x256xf32>
    %216 = vector.extract_strided_slice %215 {offsets = [0, 0], sizes = [2, 64], strides = [1, 1]} : vector<2x256xf32> to vector<2x64xf32>
    %217 = vector.extract_strided_slice %215 {offsets = [0, 64], sizes = [2, 64], strides = [1, 1]} : vector<2x256xf32> to vector<2x64xf32>
    %218 = vector.extract_strided_slice %215 {offsets = [0, 128], sizes = [2, 64], strides = [1, 1]} : vector<2x256xf32> to vector<2x64xf32>
    %cst_60 = arith.constant 2.000000e+00 : f32
    %219 = vector.broadcast %cst_60 : f32 to vector<2x64xf32>
    %220 = arith.mulf %219, %218 : vector<2x64xf32>
    %cst_61 = arith.constant 1.000000e+00 : f32
    %221 = vector.broadcast %cst_61 : f32 to vector<2x64xf32>
    %222 = arith.subf %220, %221 : vector<2x64xf32>
    %223 = vector.extract_strided_slice %215 {offsets = [0, 192], sizes = [2, 64], strides = [1, 1]} : vector<2x256xf32> to vector<2x64xf32>
    %224 = arith.mulf %217, %187 : vector<2x64xf32>
    %225 = arith.mulf %216, %222 : vector<2x64xf32>
    %226 = arith.addf %224, %225 : vector<2x64xf32>
    %cst_62 = arith.constant 2.000000e+00 : f32
    %227 = vector.broadcast %cst_62 : f32 to vector<2x64xf32>
    %228 = arith.mulf %227, %226 : vector<2x64xf32>
    %229 = arith.negf %228 : vector<2x64xf32>
    %230 = math.exp %229 : vector<2x64xf32>
    %cst_63 = arith.constant 1.000000e+00 : f32
    %231 = vector.broadcast %cst_63 : f32 to vector<2x64xf32>
    %232 = arith.addf %231, %230 : vector<2x64xf32>
    %233 = arith.divf %231, %232 : vector<2x64xf32>
    %cst_64 = arith.constant 2.000000e+00 : f32
    %234 = vector.broadcast %cst_64 : f32 to vector<2x64xf32>
    %235 = arith.mulf %234, %233 : vector<2x64xf32>
    %cst_65 = arith.constant 1.000000e+00 : f32
    %236 = vector.broadcast %cst_65 : f32 to vector<2x64xf32>
    %237 = arith.subf %235, %236 : vector<2x64xf32>
    %238 = arith.mulf %223, %237 : vector<2x64xf32>
    %c6_i32 = arith.constant 6 : i32
    %239 = arith.index_cast %c6_i32 : i32 to index
    %c0_66 = arith.constant 0 : index
    %c0_67 = arith.constant 0 : index
    %240 = vector.load %arg0[%239, %c0_66, %c0_67] : memref<8x2x1xf32, #tpu.memory_space<vmem>>, vector<1x2x1xf32>
    %241 = vector.shape_cast %240 : vector<1x2x1xf32> to vector<2x1xf32>
    %242 = vector.broadcast %241 : vector<2x1xf32> to vector<2x256xf32>
    %243 = vector.broadcast %0 : vector<1x256xf32> to vector<2x256xf32>
    %244 = arith.mulf %242, %243 : vector<2x256xf32>
    %245 = vector.broadcast %1 : vector<1x256xf32> to vector<2x256xf32>
    %246 = arith.addf %244, %245 : vector<2x256xf32>
    %247 = arith.truncf %238 : vector<2x64xf32> to vector<2x64xbf16>
    %cst_68 = arith.constant dense<0.000000e+00> : vector<2x256xf32>
    %248 = tpu.matmul %247, %2, %cst_68 {dimension_numbers = #tpu.dot_dimension_numbers<[1], [0], [0], [1], [0, 0, 1, 1], [], []>} : vector<2x64xbf16>, vector<64x256xbf16>, vector<2x256xf32> -> vector<2x256xf32>
    %249 = arith.addf %246, %248 : vector<2x256xf32>
    %250 = arith.negf %249 : vector<2x256xf32>
    %251 = math.exp %250 : vector<2x256xf32>
    %cst_69 = arith.constant 1.000000e+00 : f32
    %252 = vector.broadcast %cst_69 : f32 to vector<2x256xf32>
    %253 = arith.addf %252, %251 : vector<2x256xf32>
    %254 = arith.divf %252, %253 : vector<2x256xf32>
    %255 = vector.extract_strided_slice %254 {offsets = [0, 0], sizes = [2, 64], strides = [1, 1]} : vector<2x256xf32> to vector<2x64xf32>
    %256 = vector.extract_strided_slice %254 {offsets = [0, 64], sizes = [2, 64], strides = [1, 1]} : vector<2x256xf32> to vector<2x64xf32>
    %257 = vector.extract_strided_slice %254 {offsets = [0, 128], sizes = [2, 64], strides = [1, 1]} : vector<2x256xf32> to vector<2x64xf32>
    %cst_70 = arith.constant 2.000000e+00 : f32
    %258 = vector.broadcast %cst_70 : f32 to vector<2x64xf32>
    %259 = arith.mulf %258, %257 : vector<2x64xf32>
    %cst_71 = arith.constant 1.000000e+00 : f32
    %260 = vector.broadcast %cst_71 : f32 to vector<2x64xf32>
    %261 = arith.subf %259, %260 : vector<2x64xf32>
    %262 = vector.extract_strided_slice %254 {offsets = [0, 192], sizes = [2, 64], strides = [1, 1]} : vector<2x256xf32> to vector<2x64xf32>
    %263 = arith.mulf %256, %226 : vector<2x64xf32>
    %264 = arith.mulf %255, %261 : vector<2x64xf32>
    %265 = arith.addf %263, %264 : vector<2x64xf32>
    %cst_72 = arith.constant 2.000000e+00 : f32
    %266 = vector.broadcast %cst_72 : f32 to vector<2x64xf32>
    %267 = arith.mulf %266, %265 : vector<2x64xf32>
    %268 = arith.negf %267 : vector<2x64xf32>
    %269 = math.exp %268 : vector<2x64xf32>
    %cst_73 = arith.constant 1.000000e+00 : f32
    %270 = vector.broadcast %cst_73 : f32 to vector<2x64xf32>
    %271 = arith.addf %270, %269 : vector<2x64xf32>
    %272 = arith.divf %270, %271 : vector<2x64xf32>
    %cst_74 = arith.constant 2.000000e+00 : f32
    %273 = vector.broadcast %cst_74 : f32 to vector<2x64xf32>
    %274 = arith.mulf %273, %272 : vector<2x64xf32>
    %cst_75 = arith.constant 1.000000e+00 : f32
    %275 = vector.broadcast %cst_75 : f32 to vector<2x64xf32>
    %276 = arith.subf %274, %275 : vector<2x64xf32>
    %277 = arith.mulf %262, %276 : vector<2x64xf32>
    %c7_i32 = arith.constant 7 : i32
    %278 = arith.index_cast %c7_i32 : i32 to index
    %c0_76 = arith.constant 0 : index
    %c0_77 = arith.constant 0 : index
    %279 = vector.load %arg0[%278, %c0_76, %c0_77] : memref<8x2x1xf32, #tpu.memory_space<vmem>>, vector<1x2x1xf32>
    %280 = vector.shape_cast %279 : vector<1x2x1xf32> to vector<2x1xf32>
    %281 = vector.broadcast %280 : vector<2x1xf32> to vector<2x256xf32>
    %282 = vector.broadcast %0 : vector<1x256xf32> to vector<2x256xf32>
    %283 = arith.mulf %281, %282 : vector<2x256xf32>
    %284 = vector.broadcast %1 : vector<1x256xf32> to vector<2x256xf32>
    %285 = arith.addf %283, %284 : vector<2x256xf32>
    %286 = arith.truncf %277 : vector<2x64xf32> to vector<2x64xbf16>
    %cst_78 = arith.constant dense<0.000000e+00> : vector<2x256xf32>
    %287 = tpu.matmul %286, %2, %cst_78 {dimension_numbers = #tpu.dot_dimension_numbers<[1], [0], [0], [1], [0, 0, 1, 1], [], []>} : vector<2x64xbf16>, vector<64x256xbf16>, vector<2x256xf32> -> vector<2x256xf32>
    %288 = arith.addf %285, %287 : vector<2x256xf32>
    %289 = arith.negf %288 : vector<2x256xf32>
    %290 = math.exp %289 : vector<2x256xf32>
    %cst_79 = arith.constant 1.000000e+00 : f32
    %291 = vector.broadcast %cst_79 : f32 to vector<2x256xf32>
    %292 = arith.addf %291, %290 : vector<2x256xf32>
    %293 = arith.divf %291, %292 : vector<2x256xf32>
    %294 = vector.extract_strided_slice %293 {offsets = [0, 0], sizes = [2, 64], strides = [1, 1]} : vector<2x256xf32> to vector<2x64xf32>
    %295 = vector.extract_strided_slice %293 {offsets = [0, 64], sizes = [2, 64], strides = [1, 1]} : vector<2x256xf32> to vector<2x64xf32>
    %296 = vector.extract_strided_slice %293 {offsets = [0, 128], sizes = [2, 64], strides = [1, 1]} : vector<2x256xf32> to vector<2x64xf32>
    %cst_80 = arith.constant 2.000000e+00 : f32
    %297 = vector.broadcast %cst_80 : f32 to vector<2x64xf32>
    %298 = arith.mulf %297, %296 : vector<2x64xf32>
    %cst_81 = arith.constant 1.000000e+00 : f32
    %299 = vector.broadcast %cst_81 : f32 to vector<2x64xf32>
    %300 = arith.subf %298, %299 : vector<2x64xf32>
    %301 = vector.extract_strided_slice %293 {offsets = [0, 192], sizes = [2, 64], strides = [1, 1]} : vector<2x256xf32> to vector<2x64xf32>
    %302 = arith.mulf %295, %265 : vector<2x64xf32>
    %303 = arith.mulf %294, %300 : vector<2x64xf32>
    %304 = arith.addf %302, %303 : vector<2x64xf32>
    %cst_82 = arith.constant 2.000000e+00 : f32
    %305 = vector.broadcast %cst_82 : f32 to vector<2x64xf32>
    %306 = arith.mulf %305, %304 : vector<2x64xf32>
    %307 = arith.negf %306 : vector<2x64xf32>
    %308 = math.exp %307 : vector<2x64xf32>
    %cst_83 = arith.constant 1.000000e+00 : f32
    %309 = vector.broadcast %cst_83 : f32 to vector<2x64xf32>
    %310 = arith.addf %309, %308 : vector<2x64xf32>
    %311 = arith.divf %309, %310 : vector<2x64xf32>
    %cst_84 = arith.constant 2.000000e+00 : f32
    %312 = vector.broadcast %cst_84 : f32 to vector<2x64xf32>
    %313 = arith.mulf %312, %311 : vector<2x64xf32>
    %cst_85 = arith.constant 1.000000e+00 : f32
    %314 = vector.broadcast %cst_85 : f32 to vector<2x64xf32>
    %315 = arith.subf %313, %314 : vector<2x64xf32>
    %316 = arith.mulf %301, %315 : vector<2x64xf32>
    %c8_i32 = arith.constant 8 : i32
    %317 = arith.truncf %316 : vector<2x64xf32> to vector<2x64xbf16>
    %c0_86 = arith.constant 0 : index
    %c0_87 = arith.constant 0 : index
    %318 = vector.load %arg4[%c0_86, %c0_87] : memref<64x128xbf16, #tpu.memory_space<vmem>>, vector<64x128xbf16>
    %cst_88 = arith.constant dense<0.000000e+00> : vector<2x128xf32>
    %319 = tpu.matmul %317, %318, %cst_88 {dimension_numbers = #tpu.dot_dimension_numbers<[1], [0], [0], [1], [0, 0, 1, 1], [], []>} : vector<2x64xbf16>, vector<64x128xbf16>, vector<2x128xf32> -> vector<2x128xf32>
    %c0_89 = arith.constant 0 : index
    %c0_90 = arith.constant 0 : index
    %320 = vector.load %arg5[%c0_89, %c0_90] : memref<1x128xf32, #tpu.memory_space<vmem>>, vector<1x128xf32>
    %321 = vector.broadcast %320 : vector<1x128xf32> to vector<2x128xf32>
    %322 = arith.addf %319, %321 : vector<2x128xf32>
    %c0_91 = arith.constant 0 : index
    %c0_92 = arith.constant 0 : index
    %323 = vector.load %arg6[%c0_91, %c0_92] : memref<2x128xf32, #tpu.memory_space<vmem>>, vector<2x128xf32>
    tpu.vector_store %arg6[%c0_91, %c0_92], %322 {strides = array<i32>} : memref<2x128xf32, #tpu.memory_space<vmem>>, vector<2x128xf32>,
    return
  }
}

</mosaic_0001>

<bundles_post_ra>
// kernel: posture_rnn_forward.1
= control target key start
LH: loop header
LB: loop body
LE: loop exit
PB: predicated region body
PF: predicated region fallthrough
CT: control target
= control target key end

     0   :  { %11 = vsyncpa [#allocation3], 0  ;;  %s1522_s0 = inlined_call_operand.vmem [shape: f32[8,2,1], index: 0, kind: input, shape index: {}]   ;;  %s1523_s1 = inlined_call_operand.vmem [shape: f32[1,256], index: 1, kind: input, shape index: {}]   ;;  %s1524_s2 = inlined_call_operand.hbm [shape: f32[1,256], index: 2, kind: input, shape index: {}]   ;;  %s1525_s3 = inlined_call_operand.hbm [shape: bf16[64,256], index: 3, kind: input, shape index: {}]   ;;  %s1526_s4 = inlined_call_operand.vmem [shape: bf16[64,128], index: 4, kind: input, shape index: {}]   ;;  %s1527_s5 = inlined_call_operand.vmem [shape: f32[1,128], index: 5, kind: input, shape index: {}]   ;;  %s1528_s6 = inlined_call_operand.hbm [shape: f32[2,128], index: 6, kind: output, shape index: {}]  }
   0x1   :  { %12 = vsyncpa [#allocation6], 0 }
   0x2   :  { %13 = vsyncpa [#allocation4], 0  ;;  %s1238_s21 = smov [#allocation2]   ;;  %s1239_s23 = smov [#allocation5]  }
   0x3   :  { %s24_s22 = sshll.u32 %s1238_s21, 4  ;;  %s33_s24 = sshll.u32 %s1239_s23, 4  ;;  %s25_s22 = int_to_ptr.vmem [resolvable:$true] %s24_s22  ;;  %s1282_s24 = int_to_ptr.vmem [resolvable:$true] %s33_s24 }
   0x4   :  { %s1166_s27 = scalar_lea.hbm %s1524_s2, 32 }
   0x5   :  { %p1167_p0 = scmp.ne.s32.totalorder %s1524_s2, %s1166_s27  ;;  %p1170_p1 = scmp.lt.u32.totalorder %s1166_s27, %s1524_s2 }
   0x7   :  { %p1172_p2 = pnand %p1170_p1, %p1167_p0 }
   0x9   :  { %1175 = shalt.err (!%p1172_p2)
}
   0xa   :  { %s1176_s8 = scalar_lea.vmem %s25_s22, 32  ;;  %p1181_p4 = scmp.lt.s32.totalorder %s25_s22, %s25_s22 }
   0xb   :  { %p1177_p3 = scmp.ne.s32.totalorder %s25_s22, %s1176_s8  ;;  %p1182_p5 = scmp.lt.s32.totalorder %s1176_s8, %s1176_s8 }
   0xd   :  { %p1183_p6 = por %p1182_p5, %p1181_p4 }
   0xf   :  { %p1184_p7 = pnand %p1183_p6, %p1177_p3 }
  0x11   :  { %1187 = shalt.err (!%p1184_p7)
}
  0x12   :  { %27 = dma.hbm_to_vmem [thread:$0]  %s1524_s2, 32, %s25_s22, [#allocation3]  }
  0x13   :  { %s1188_s13 = scalar_lea.hbm %s1525_s3, 1024 }
  0x14   :  { %p1189_p8 = scmp.ne.s32.totalorder %s1525_s3, %s1188_s13  ;;  %p1192_p9 = scmp.lt.u32.totalorder %s1188_s13, %s1525_s3 }
  0x16   :  { %p1194_p10 = pnand %p1192_p9, %p1189_p8 }
  0x18   :  { %1197 = shalt.err (!%p1194_p10)
}
  0x19   :  { %s1198_s18 = scalar_lea.vmem %s1282_s24, 1024  ;;  %p1203_p12 = scmp.lt.s32.totalorder %s1282_s24, %s1282_s24 }
  0x1a   :  { %p1199_p11 = scmp.ne.s32.totalorder %s1282_s24, %s1198_s18  ;;  %p1204_p13 = scmp.lt.s32.totalorder %s1198_s18, %s1198_s18 }
  0x1c   :  { %p1205_p0 = por %p1204_p13, %p1203_p12 }
  0x1e   :  { %p1206_p1 = pnand %p1205_p0, %p1199_p11 }
  0x20   :  { %1209 = shalt.err (!%p1206_p1)
}
  0x21   :  { %s1240_s2 = smov 128   ;;  %s1241_s19 = smov 8  }
  0x22   :  { %39 = dma.hbm_to_vmem [thread:$0]  %s1525_s3, 1024, %s1282_s24, [#allocation6], %s1240_s2, %s1240_s2, %s1241_s19  }
  0x23   :  { %1232 = dma.done.wait [#allocation3], 32  }
  0x24   :  { %1233 = vsyncadd [#allocation3], 4294967264 }
  0x25   :  { %1234 = dma.done.wait [#allocation6], 1024  }
  0x26   :  { %1235 = vsyncadd [#allocation6], 4294966272  ;;  %v1242_v0 = vmov 0   ;;  %v1317_v1 = vld [vmem:[#allocation5 + $0x4] ss:$8 sps:$4 sm:$0xff]   ;;  %v68_v10 = vlaneseq  ;;  %vm133_vm0 = vcmask 523264  }
  0x27   :  { %169 = vmatprep.mubr.bf16.mxu0 %v1242_v0  ;;  %1052 = vset.pattern.permute.xlu0 %v1242_v0  ;;  %v1319_v2 = vld [vmem:[#allocation5] ss:$8 sps:$4 sm:$0xff]   ;;  %v1322_v3 = vld [vmem:[#allocation5 + $0x14] ss:$8 sps:$4 sm:$0xff]   ;;  %v1326_v4 = vld [vmem:[#allocation5 + $0x10] ss:$8 sps:$4 sm:$0xff]  }
  0x28   :  { %261 = vmatprep.mubr.bf16.mxu1 %v1242_v0  ;;  %1053 = vset.pattern.permute.xlu1 %v1242_v0  ;;  %v1330_v5 = vld [vmem:[#allocation5 + $0x24] ss:$8 sps:$4 sm:$0xff]   ;;  %v1333_v6 = vld [vmem:[#allocation5 + $0x20] ss:$8 sps:$4 sm:$0xff]   ;;  %v1338_v8 = vld [vmem:[#allocation5 + $0x34] ss:$8 sps:$4 sm:$0xff]  }
  0x29   :  { %137 = vmatprep.subr.bf16.mxu0 %v1317_v1  ;;  %229 = vmatprep.subr.bf16.mxu1 %v1317_v1  ;;  %v61_v7 = vld [vmem:[%s1522_s0] sm:$0x3]  ;;  %v1345_v9 = vld [vmem:[#allocation5 + $0x30] ss:$8 sps:$4 sm:$0xff]   ;;  %v69_v11 = vshrl.u32 %v68_v10, 7  ;;  %vm1245_vm1 = vmmov 0  }
  0x2a   :  { %138 = vmatpush1.bf16.msra.mxu0 %v1319_v2  ;;  %230 = vmatpush1.bf16.msra.mxu1 %v1319_v2  ;;  %v51_v14 = vld [vmem:[%s1523_s1] sm:$0x3]  ;;  %v52_v18 = vld [vmem:[#allocation2] sm:$0x3]  ;;  %s1243_s1 = smov 64   ;;  %s1246_s3 = smov [#allocation7]  }
  0x2b   :  { %139 = vmatprep.subr.bf16.mxu0 %v1322_v3  ;;  %231 = vmatprep.subr.bf16.mxu1 %v1322_v3  ;;  %v70_v12 = vsub.s32 0, %v69_v11  ;;  %v74_v13 = vsub.s32 1, %v69_v11  ;;  %v971_v54 = vld [vmem:[%s1522_s0 + $0x2] sm:$0x3]  ;;  %s948_s22 = sshll.u32 %s1246_s3, 4  ;;  %s949_s22 = int_to_ptr.vmem [resolvable:$true] %s948_s22 }
  0x2c   :  { %64 = vperm.xlu0 %1052, %v61_v7   ;;  %s1210_s23 = scalar_lea.vmem %s949_s22, 32  ;;  %p1215_p3 = scmp.lt.s32.totalorder %s949_s22, %s949_s22 }
  0x2d   :  { %v1367_v15 = vrot.slane %v51_v14, %v70_v12  ;;  %v1369_v17 = vrot.slane %v51_v14, %v74_v13  ;;  %v1372_v20 = vrot.slane %v52_v18, %v70_v12  ;;  %v1375_v22 = vrot.slane %v52_v18, %v74_v13  ;;  %p1211_p2 = scmp.ne.s32.totalorder %s949_s22, %s1210_s23  ;;  %p1216_p4 = scmp.lt.s32.totalorder %s1210_s23, %s1210_s23 }
  0x2e   :  { %140 = vmatpush1.bf16.msra.mxu0 %v1326_v4  ;;  %232 = vmatpush1.bf16.msra.mxu1 %v1326_v4 }
  0x2f   :  { %141 = vmatprep.subr.bf16.mxu0 %v1330_v5  ;;  %233 = vmatprep.subr.bf16.mxu1 %v1330_v5  ;;  %p1217_p5 = por %p1216_p4, %p1215_p3 }
  0x31   :  { %p1218_p6 = pnand %p1217_p5, %p1211_p2 }
  0x32   :  { %142 = vmatpush1.bf16.msra.mxu0 %v1333_v6  ;;  %234 = vmatpush1.bf16.msra.mxu1 %v1333_v6 }
  0x33   :  { %143 = vmatprep.subr.bf16.mxu0 %v1338_v8  ;;  %235 = vmatprep.subr.bf16.mxu1 %v1338_v8 }
  0x36   :  { %144 = vmatpush1.bf16.msra.mxu0 %v1345_v9  ;;  %236 = vmatpush1.bf16.msra.mxu1 %v1345_v9 }
  0x37   :  { %321 = vmatprep.subr.bf16.mxu0 %v1317_v1  ;;  %413 = vmatprep.subr.bf16.mxu1 %v1317_v1 }
  0x39   :  { %170 = vmatmul.mubr.bf16.vlgmr.msra.gmra.mrb[0].mxu0 %v1242_v0 }
  0x3a   :  { %322 = vmatpush1.bf16.msra.mxu0 %v1319_v2  ;;  %353 = vmatprep.mubr.bf16.mxu0 %v1242_v0 }
  0x3b   :  { %323 = vmatprep.subr.bf16.mxu0 %v1322_v3 }
  0x3e   :  { %324 = vmatpush1.bf16.msra.mxu0 %v1326_v4 }
  0x3f   :  { %325 = vmatprep.subr.bf16.mxu0 %v1330_v5 }
  0x42   :  { %326 = vmatpush1.bf16.msra.mxu0 %v1333_v6 }
  0x43   :  { %327 = vmatprep.subr.bf16.mxu0 %v1338_v8 }
  0x46   :  { %328 = vmatpush1.bf16.msra.mxu0 %v1345_v9 }
  0x47   :  { %505 = vmatprep.subr.bf16.mxu0 %v1317_v1 }
  0xab   :  { %v65_v16 = vpop.permute.xlu0 %64 }
  0xac   :  { %v78_v19 = vmul.f32 %v1367_v15, %v65_v16  ;;  %v79_v21 = vmul.f32 %v1369_v17, %v65_v16 }
  0xae   :  { %v91_v23 = vadd.f32 %v1372_v20, %v78_v19  ;;  %v92_v24 = vadd.f32 %v1375_v22, %v79_v21 }
 0x10c   :  { %v171_v25 = vpop.f32.mrb[0].mxu0 }
 0x10d   :  { %v178_v26 = vadd.f32 %v171_v25, %v91_v23  ;;  %v173_v27 = vpop.f32.mrb[1].mxu0 }
 0x10e   :  { %v179_v28 = vadd.f32 %v173_v27, %v92_v24  ;;  %v175_v29 = vpop.f32.mrb[2].mxu0  ;;  %v978_v27 = vld [vmem:[%s1522_s0 + $0x4] sm:$0x3] }
 0x10f   :  { %v966_v30 = vmul.f32 -1.442695, %v178_v26  ;;  %v176_v31 = vpop.f32.mrb[3].mxu0 }
 0x110   :  { %v967_v32 = vmul.f32 -1.442695, %v179_v28 }
 0x111   :  { %1070 = vpow2.f32 %v966_v30 }
 0x112   :  { %1072 = vpow2.f32 %v967_v32 }
 0x11b   :  { %v1071_v33 = vpop.eup %1070 }
 0x11c   :  { %v1073_v34 = vpop.eup %1072  ;;  %v186_v36 = vadd.f32 1.0, %v1071_v33 }
 0x11d   :  { %v187_v35 = vadd.f32 1.0, %v1073_v34 }
 0x11f   :  { %1074 = vrcp.f32 %v187_v35 }
 0x120   :  { %1076 = vrcp.f32 %v186_v36 }
 0x129   :  { %v1075_v37 = vpop.eup %1074 }
 0x12a   :  { %v192_v38 = vmul.f32 2.0, %v1075_v37  ;;  %v1077_v40 = vpop.eup %1076 }
 0x12b   :  { %v194_v42 = vmul.f32 0.0, %v1077_v40 }
 0x12c   :  { %v968_v39 = vadd.f32 -1.0, %v192_v38 }
 0x12e   :  { %v195_v41 = vmul.f32 %v1077_v40, %v968_v39 }
 0x130   :  { %197 = vrot.lane.b32.xlu0 %v195_v41, %s1243_s1 }
 0x1a2   :  { %v198_v43 = vpop.permute.xlu0 %197 }
 0x1a3   :  { %v200_v44 = vadd.f32 %v198_v43, %v194_v42 }
 0x1a5   :  { %v969_v45 = vmul.f32 -2.0, %v200_v44 }
 0x1a7   :  { %v203_v46 = vmul.f32 1.442695, %v969_v45 }
 0x1a9   :  { %1078 = vpow2.f32 %v203_v46 }
 0x1b3   :  { %v1079_v47 = vpop.eup %1078 }
 0x1b4   :  { %v205_v48 = vadd.f32 1.0, %v1079_v47 }
 0x1b6   :  { %1080 = vrcp.f32 %v205_v48 }
 0x1c0   :  { %v1081_v49 = vpop.eup %1080 }
 0x1c1   :  { %v208_v50 = vmul.f32 2.0, %v1081_v49 }
 0x1c3   :  { %v970_v51 = vadd.f32 -1.0, %v208_v50 }
 0x1c5   :  { %v210_v52 = vmul.f32 %v1075_v37, %v970_v51 }
 0x1c7   :  { %v222_v53 = vpack.c.bf16 %v210_v52, %v210_v52 }
 0x1c9   :  { %224 = vrot.lane.b32.xlu1 %v222_v53, %s1243_s1 }
 0x1cd   :  { %215 = vperm.xlu1 %1053, %v971_v54  }
 0x23b   :  { %v225_v55 = vpop.permute.xlu1 %224 }
 0x23c   :  { %972 = vmatmul.mubr.msk.bf16.vlgmr.msra.gmra.mrb[0].mxu1 %vm133_vm0, %v225_v55 }
 0x23d   :  { %414 = vmatpush1.bf16.msra.mxu1 %v1319_v2  ;;  %445 = vmatprep.mubr.bf16.mxu1 %v1242_v0 }
 0x23e   :  { %415 = vmatprep.subr.bf16.mxu1 %v1322_v3 }
 0x241   :  { %416 = vmatpush1.bf16.msra.mxu1 %v1326_v4 }
 0x242   :  { %417 = vmatprep.subr.bf16.mxu1 %v1330_v5 }
 0x245   :  { %418 = vmatpush1.bf16.msra.mxu1 %v1333_v6 }
 0x246   :  { %419 = vmatprep.subr.bf16.mxu1 %v1338_v8 }
 0x249   :  { %420 = vmatpush1.bf16.msra.mxu1 %v1345_v9 }
 0x24a   :  { %597 = vmatprep.subr.bf16.mxu1 %v1317_v1 }
 0x24c   :  { %v216_v56 = vpop.permute.xlu1 %215 }
 0x24d   :  { %v218_v57 = vmul.f32 %v216_v56, %v1367_v15  ;;  %v219_v58 = vmul.f32 %v216_v56, %v1369_v17 }
 0x24f   :  { %v220_v59 = vadd.f32 %v218_v57, %v1372_v20  ;;  %v221_v60 = vadd.f32 %v219_v58, %v1375_v22 }
 0x30f   :  { %v263_v61 = vpop.f32.mrb[0].mxu1 }
 0x310   :  { %v270_v62 = vadd.f32 %v263_v61, %v220_v59  ;;  %v265_v63 = vpop.f32.mrb[1].mxu1 }
 0x311   :  { %v271_v7 = vadd.f32 %v265_v63, %v221_v60  ;;  %v267_v10 = vpop.f32.mrb[2].mxu1  ;;  %v985_v63 = vld [vmem:[%s1522_s0 + $0x6] sm:$0x3] }
 0x312   :  { %v973_v11 = vmul.f32 -1.442695, %v270_v62  ;;  %v268_v12 = vpop.f32.mrb[3].mxu1 }
 0x313   :  { %v974_v13 = vmul.f32 -1.442695, %v271_v7 }
 0x314   :  { %1082 = vpow2.f32 %v973_v11 }
 0x315   :  { %1084 = vpow2.f32 %v974_v13 }
 0x31e   :  { %v1083_v14 = vpop.eup %1082 }
 0x31f   :  { %v1085_v16 = vpop.eup %1084  ;;  %v278_v19 = vadd.f32 1.0, %v1083_v14 }
 0x320   :  { %v279_v18 = vadd.f32 1.0, %v1085_v16 }
 0x322   :  { %1086 = vrcp.f32 %v279_v18 }
 0x323   :  { %1088 = vrcp.f32 %v278_v19 }
 0x32c   :  { %v1087_v21 = vpop.eup %1086 }
 0x32d   :  { %v284_v23 = vmul.f32 2.0, %v1087_v21  ;;  %v1089_v25 = vpop.eup %1088 }
 0x32e   :  { %v286_v28 = vmul.f32 %v1089_v25, %v200_v44 }
 0x32f   :  { %v975_v24 = vadd.f32 -1.0, %v284_v23 }
 0x331   :  { %v287_v26 = vmul.f32 %v1089_v25, %v975_v24 }
 0x333   :  { %289 = vrot.lane.b32.xlu0 %v287_v26, %s1243_s1 }
 0x337   :  { %307 = vperm.xlu0 %1052, %v978_v27  }
 0x3a5   :  { %v290_v29 = vpop.permute.xlu0 %289 }
 0x3a6   :  { %v292_v30 = vadd.f32 %v290_v29, %v286_v28 }
 0x3a8   :  { %v976_v31 = vmul.f32 -2.0, %v292_v30 }
 0x3aa   :  { %v295_v32 = vmul.f32 1.442695, %v976_v31 }
 0x3ac   :  { %1090 = vpow2.f32 %v295_v32 }
 0x3b6   :  { %v1091_v33 = vpop.eup %1090  ;;  %v308_v41 = vpop.permute.xlu0 %307 }
 0x3b7   :  { %v297_v34 = vadd.f32 1.0, %v1091_v33  ;;  %v310_v42 = vmul.f32 %v308_v41, %v1367_v15  ;;  %v311_v43 = vmul.f32 %v308_v41, %v1369_v17 }
 0x3b9   :  { %1092 = vrcp.f32 %v297_v34  ;;  %v312_v44 = vadd.f32 %v310_v42, %v1372_v20  ;;  %v313_v46 = vadd.f32 %v311_v43, %v1375_v22 }
 0x3c3   :  { %v1093_v35 = vpop.eup %1092 }
 0x3c4   :  { %v300_v36 = vmul.f32 2.0, %v1093_v35 }
 0x3c6   :  { %v977_v37 = vadd.f32 -1.0, %v300_v36 }
 0x3c8   :  { %v302_v38 = vmul.f32 %v1087_v21, %v977_v37 }
 0x3ca   :  { %v314_v39 = vpack.c.bf16 %v302_v38, %v302_v38 }
 0x3cc   :  { %316 = vrot.lane.b32.xlu1 %v314_v39, %s1243_s1 }
 0x43e   :  { %v317_v40 = vpop.permute.xlu1 %316 }
 0x43f   :  { %979 = vmatmul.mubr.msk.bf16.vlgmr.msra.gmra.mrb[4].mxu0 %vm133_vm0, %v317_v40 }
 0x440   :  { %506 = vmatpush1.bf16.msra.mxu0 %v1319_v2  ;;  %537 = vmatprep.mubr.bf16.mxu0 %v1242_v0 }
 0x441   :  { %507 = vmatprep.subr.bf16.mxu0 %v1322_v3 }
 0x444   :  { %508 = vmatpush1.bf16.msra.mxu0 %v1326_v4 }
 0x445   :  { %509 = vmatprep.subr.bf16.mxu0 %v1330_v5 }
 0x448   :  { %510 = vmatpush1.bf16.msra.mxu0 %v1333_v6 }
 0x449   :  { %511 = vmatprep.subr.bf16.mxu0 %v1338_v8 }
 0x44c   :  { %512 = vmatpush1.bf16.msra.mxu0 %v1345_v9 }
 0x44d   :  { %689 = vmatprep.subr.bf16.mxu0 %v1317_v1 }
 0x512   :  { %v355_v45 = vpop.f32.mrb[4].mxu0 }
 0x513   :  { %v362_v47 = vadd.f32 %v355_v45, %v312_v44  ;;  %v357_v48 = vpop.f32.mrb[5].mxu0 }
 0x514   :  { %v363_v49 = vadd.f32 %v357_v48, %v313_v46  ;;  %v359_v50 = vpop.f32.mrb[6].mxu0 }
 0x515   :  { %v980_v51 = vmul.f32 -1.442695, %v362_v47  ;;  %v360_v52 = vpop.f32.mrb[7].mxu0  ;;  %v992_v47 = vld [vmem:[%s1522_s0 + $0x8] sm:$0x3] }
 0x516   :  { %v981_v53 = vmul.f32 -1.442695, %v363_v49 }
 0x517   :  { %1094 = vpow2.f32 %v980_v51 }
 0x518   :  { %1096 = vpow2.f32 %v981_v53 }
 0x521   :  { %v1095_v54 = vpop.eup %1094 }
 0x522   :  { %v1097_v55 = vpop.eup %1096  ;;  %v370_v57 = vadd.f32 1.0, %v1095_v54 }
 0x523   :  { %v371_v56 = vadd.f32 1.0, %v1097_v55 }
 0x525   :  { %1098 = vrcp.f32 %v371_v56 }
 0x526   :  { %1100 = vrcp.f32 %v370_v57 }
 0x52f   :  { %v1099_v58 = vpop.eup %1098 }
 0x530   :  { %v376_v59 = vmul.f32 2.0, %v1099_v58  ;;  %v1101_v61 = vpop.eup %1100 }
 0x531   :  { %v378_v7 = vmul.f32 %v1101_v61, %v292_v30 }
 0x532   :  { %v982_v60 = vadd.f32 -1.0, %v376_v59 }
 0x534   :  { %v379_v62 = vmul.f32 %v1101_v61, %v982_v60 }
 0x536   :  { %381 = vrot.lane.b32.xlu1 %v379_v62, %s1243_s1 }
 0x53a   :  { %399 = vperm.xlu1 %1053, %v985_v63  }
 0x5a8   :  { %v382_v10 = vpop.permute.xlu1 %381 }
 0x5a9   :  { %v384_v11 = vadd.f32 %v382_v10, %v378_v7 }
 0x5ab   :  { %v983_v12 = vmul.f32 -2.0, %v384_v11 }
 0x5ad   :  { %v387_v13 = vmul.f32 1.442695, %v983_v12 }
 0x5af   :  { %1102 = vpow2.f32 %v387_v13 }
 0x5b9   :  { %v1103_v14 = vpop.eup %1102  ;;  %v400_v26 = vpop.permute.xlu1 %399 }
 0x5ba   :  { %v389_v16 = vadd.f32 1.0, %v1103_v14  ;;  %v402_v27 = vmul.f32 %v400_v26, %v1367_v15  ;;  %v403_v28 = vmul.f32 %v400_v26, %v1369_v17 }
 0x5bc   :  { %1104 = vrcp.f32 %v389_v16  ;;  %v404_v29 = vadd.f32 %v402_v27, %v1372_v20  ;;  %v405_v31 = vadd.f32 %v403_v28, %v1375_v22 }
 0x5c6   :  { %v1105_v18 = vpop.eup %1104 }
 0x5c7   :  { %v392_v19 = vmul.f32 2.0, %v1105_v18 }
 0x5c9   :  { %v984_v21 = vadd.f32 -1.0, %v392_v19 }
 0x5cb   :  { %v394_v23 = vmul.f32 %v1099_v58, %v984_v21 }
 0x5cd   :  { %v406_v24 = vpack.c.bf16 %v394_v23, %v394_v23 }
 0x5cf   :  { %408 = vrot.lane.b32.xlu0 %v406_v24, %s1243_s1 }
 0x641   :  { %v409_v25 = vpop.permute.xlu0 %408 }
 0x642   :  { %986 = vmatmul.mubr.msk.bf16.vlgmr.msra.gmra.mrb[4].mxu1 %vm133_vm0, %v409_v25 }
 0x643   :  { %598 = vmatpush1.bf16.msra.mxu1 %v1319_v2  ;;  %629 = vmatprep.mubr.bf16.mxu1 %v1242_v0 }
 0x644   :  { %599 = vmatprep.subr.bf16.mxu1 %v1322_v3 }
 0x647   :  { %600 = vmatpush1.bf16.msra.mxu1 %v1326_v4 }
 0x648   :  { %601 = vmatprep.subr.bf16.mxu1 %v1330_v5 }
 0x64b   :  { %602 = vmatpush1.bf16.msra.mxu1 %v1333_v6 }
 0x64c   :  { %603 = vmatprep.subr.bf16.mxu1 %v1338_v8 }
 0x64f   :  { %604 = vmatpush1.bf16.msra.mxu1 %v1345_v9 }
 0x650   :  { %781 = vmatprep.subr.bf16.mxu1 %v1317_v1 }
 0x715   :  { %v447_v30 = vpop.f32.mrb[4].mxu1 }
 0x716   :  { %v454_v32 = vadd.f32 %v447_v30, %v404_v29  ;;  %v449_v33 = vpop.f32.mrb[5].mxu1 }
 0x717   :  { %v455_v34 = vadd.f32 %v449_v33, %v405_v31  ;;  %v451_v35 = vpop.f32.mrb[6].mxu1 }
 0x718   :  { %v987_v36 = vmul.f32 -1.442695, %v454_v32  ;;  %v452_v37 = vpop.f32.mrb[7].mxu1  ;;  %v999_v32 = vld [vmem:[%s1522_s0 + $0xa] sm:$0x3] }
 0x719   :  { %v988_v38 = vmul.f32 -1.442695, %v455_v34 }
 0x71a   :  { %1106 = vpow2.f32 %v987_v36 }
 0x71b   :  { %1108 = vpow2.f32 %v988_v38 }
 0x724   :  { %v1107_v1 = vpop.eup %1106 }
 0x725   :  { %v1109_v39 = vpop.eup %1108  ;;  %v462_v41 = vadd.f32 1.0, %v1107_v1 }
 0x726   :  { %v463_v40 = vadd.f32 1.0, %v1109_v39 }
 0x728   :  { %1110 = vrcp.f32 %v463_v40 }
 0x729   :  { %1112 = vrcp.f32 %v462_v41 }
 0x732   :  { %v1111_v42 = vpop.eup %1110 }
 0x733   :  { %v468_v43 = vmul.f32 2.0, %v1111_v42  ;;  %v1113_v45 = vpop.eup %1112 }
 0x734   :  { %v470_v48 = vmul.f32 %v1113_v45, %v384_v11 }
 0x735   :  { %v989_v44 = vadd.f32 -1.0, %v468_v43 }
 0x737   :  { %v471_v46 = vmul.f32 %v1113_v45, %v989_v44 }
 0x739   :  { %473 = vrot.lane.b32.xlu0 %v471_v46, %s1243_s1 }
 0x73d   :  { %491 = vperm.xlu0 %1052, %v992_v47  }
 0x7ab   :  { %v474_v49 = vpop.permute.xlu0 %473 }
 0x7ac   :  { %v476_v50 = vadd.f32 %v474_v49, %v470_v48 }
 0x7ae   :  { %v990_v51 = vmul.f32 -2.0, %v476_v50 }
 0x7b0   :  { %v479_v52 = vmul.f32 1.442695, %v990_v51 }
 0x7b2   :  { %1114 = vpow2.f32 %v479_v52 }
 0x7bc   :  { %v1115_v53 = vpop.eup %1114  ;;  %v492_v61 = vpop.permute.xlu0 %491 }
 0x7bd   :  { %v481_v54 = vadd.f32 1.0, %v1115_v53  ;;  %v494_v62 = vmul.f32 %v492_v61, %v1367_v15  ;;  %v495_v63 = vmul.f32 %v492_v61, %v1369_v17 }
 0x7bf   :  { %1116 = vrcp.f32 %v481_v54  ;;  %v496_v7 = vadd.f32 %v494_v62, %v1372_v20  ;;  %v497_v11 = vadd.f32 %v495_v63, %v1375_v22 }
 0x7c9   :  { %v1117_v55 = vpop.eup %1116 }
 0x7ca   :  { %v484_v56 = vmul.f32 2.0, %v1117_v55 }
 0x7cc   :  { %v991_v57 = vadd.f32 -1.0, %v484_v56 }
 0x7ce   :  { %v486_v58 = vmul.f32 %v1111_v42, %v991_v57 }
 0x7d0   :  { %v498_v59 = vpack.c.bf16 %v486_v58, %v486_v58 }
 0x7d2   :  { %500 = vrot.lane.b32.xlu1 %v498_v59, %s1243_s1  ;;  %v1006_v59 = vld [vmem:[%s1522_s0 + $0xc] sm:$0x3] }
 0x844   :  { %v501_v60 = vpop.permute.xlu1 %500 }
 0x845   :  { %993 = vmatmul.mubr.msk.bf16.vlgmr.msra.gmra.mrb[8].mxu0 %vm133_vm0, %v501_v60 }
 0x846   :  { %690 = vmatpush1.bf16.msra.mxu0 %v1319_v2  ;;  %721 = vmatprep.mubr.bf16.mxu0 %v1242_v0 }
 0x847   :  { %691 = vmatprep.subr.bf16.mxu0 %v1322_v3 }
 0x84a   :  { %692 = vmatpush1.bf16.msra.mxu0 %v1326_v4 }
 0x84b   :  { %693 = vmatprep.subr.bf16.mxu0 %v1330_v5 }
 0x84e   :  { %694 = vmatpush1.bf16.msra.mxu0 %v1333_v6 }
 0x84f   :  { %695 = vmatprep.subr.bf16.mxu0 %v1338_v8 }
 0x852   :  { %696 = vmatpush1.bf16.msra.mxu0 %v1345_v9 }
 0x918   :  { %v539_v10 = vpop.f32.mrb[8].mxu0 }
 0x919   :  { %v546_v12 = vadd.f32 %v539_v10, %v496_v7  ;;  %v541_v13 = vpop.f32.mrb[9].mxu0 }
 0x91a   :  { %v547_v14 = vadd.f32 %v541_v13, %v497_v11  ;;  %v543_v16 = vpop.f32.mrb[10].mxu0 }
 0x91b   :  { %v994_v18 = vmul.f32 -1.442695, %v546_v12  ;;  %v544_v19 = vpop.f32.mrb[11].mxu0 }
 0x91c   :  { %v995_v21 = vmul.f32 -1.442695, %v547_v14 }
 0x91d   :  { %1118 = vpow2.f32 %v994_v18 }
 0x91e   :  { %1120 = vpow2.f32 %v995_v21 }
 0x927   :  { %v1119_v23 = vpop.eup %1118 }
 0x928   :  { %v1121_v24 = vpop.eup %1120  ;;  %v554_v26 = vadd.f32 1.0, %v1119_v23 }
 0x929   :  { %v555_v25 = vadd.f32 1.0, %v1121_v24 }
 0x92b   :  { %1122 = vrcp.f32 %v555_v25 }
 0x92c   :  { %1124 = vrcp.f32 %v554_v26 }
 0x935   :  { %v1123_v27 = vpop.eup %1122 }
 0x936   :  { %v560_v28 = vmul.f32 2.0, %v1123_v27  ;;  %v1125_v30 = vpop.eup %1124 }
 0x937   :  { %v562_v33 = vmul.f32 %v1125_v30, %v476_v50 }
 0x938   :  { %v996_v29 = vadd.f32 -1.0, %v560_v28 }
 0x93a   :  { %v563_v31 = vmul.f32 %v1125_v30, %v996_v29 }
 0x93c   :  { %565 = vrot.lane.b32.xlu1 %v563_v31, %s1243_s1 }
 0x940   :  { %583 = vperm.xlu1 %1053, %v999_v32  }
 0x9ae   :  { %v566_v34 = vpop.permute.xlu1 %565 }
 0x9af   :  { %v568_v35 = vadd.f32 %v566_v34, %v562_v33 }
 0x9b1   :  { %v997_v36 = vmul.f32 -2.0, %v568_v35 }
 0x9b3   :  { %v571_v37 = vmul.f32 1.442695, %v997_v36 }
 0x9b5   :  { %1126 = vpow2.f32 %v571_v37 }
 0x9bf   :  { %v1127_v38 = vpop.eup %1126  ;;  %v584_v45 = vpop.permute.xlu1 %583 }
 0x9c0   :  { %v573_v1 = vadd.f32 1.0, %v1127_v38  ;;  %v586_v46 = vmul.f32 %v584_v45, %v1367_v15  ;;  %v587_v47 = vmul.f32 %v584_v45, %v1369_v17 }
 0x9c2   :  { %1128 = vrcp.f32 %v573_v1 }
 0x9cc   :  { %v1129_v39 = vpop.eup %1128 }
 0x9cd   :  { %v576_v40 = vmul.f32 2.0, %v1129_v39 }
 0x9cf   :  { %v998_v41 = vadd.f32 -1.0, %v576_v40 }
 0x9d1   :  { %v578_v42 = vmul.f32 %v1123_v27, %v998_v41 }
 0x9d3   :  { %v590_v43 = vpack.c.bf16 %v578_v42, %v578_v42 }
 0x9d5   :  { %592 = vrot.lane.b32.xlu0 %v590_v43, %s1243_s1  ;;  %v1013_v43 = vld [vmem:[%s1522_s0 + $0xe] sm:$0x3] }
 0xa47   :  { %v593_v44 = vpop.permute.xlu0 %592 }
 0xa48   :  { %1000 = vmatmul.mubr.msk.bf16.vlgmr.msra.gmra.mrb[8].mxu1 %vm133_vm0, %v593_v44 }
 0xa49   :  { %782 = vmatpush1.bf16.msra.mxu1 %v1319_v2  ;;  %813 = vmatprep.mubr.bf16.mxu1 %v1242_v0  ;;  %v588_v2 = vadd.f32 %v586_v46, %v1372_v20 }
 0xa4a   :  { %783 = vmatprep.subr.bf16.mxu1 %v1322_v3  ;;  %v589_v3 = vadd.f32 %v587_v47, %v1375_v22 }
 0xa4d   :  { %784 = vmatpush1.bf16.msra.mxu1 %v1326_v4 }
 0xa4e   :  { %785 = vmatprep.subr.bf16.mxu1 %v1330_v5 }
 0xa51   :  { %786 = vmatpush1.bf16.msra.mxu1 %v1333_v6 }
 0xa52   :  { %787 = vmatprep.subr.bf16.mxu1 %v1338_v8 }
 0xa55   :  { %788 = vmatpush1.bf16.msra.mxu1 %v1345_v9 }
 0xb1b   :  { %v631_v0 = vpop.f32.mrb[8].mxu1 }
 0xb1c   :  { %v638_v48 = vadd.f32 %v631_v0, %v588_v2  ;;  %v633_v4 = vpop.f32.mrb[9].mxu1 }
 0xb1d   :  { %v639_v49 = vadd.f32 %v633_v4, %v589_v3  ;;  %v635_v5 = vpop.f32.mrb[10].mxu1 }
 0xb1e   :  { %v1001_v50 = vmul.f32 -1.442695, %v638_v48  ;;  %v636_v6 = vpop.f32.mrb[11].mxu1 }
 0xb1f   :  { %v1002_v51 = vmul.f32 -1.442695, %v639_v49 }
 0xb20   :  { %1130 = vpow2.f32 %v1001_v50 }
 0xb21   :  { %1132 = vpow2.f32 %v1002_v51 }
 0xb2a   :  { %v1131_v8 = vpop.eup %1130 }
 0xb2b   :  { %v1133_v9 = vpop.eup %1132  ;;  %v646_v53 = vadd.f32 1.0, %v1131_v8 }
 0xb2c   :  { %v647_v52 = vadd.f32 1.0, %v1133_v9 }
 0xb2e   :  { %1134 = vrcp.f32 %v647_v52 }
 0xb2f   :  { %1136 = vrcp.f32 %v646_v53 }
 0xb38   :  { %v1135_v54 = vpop.eup %1134 }
 0xb39   :  { %v652_v55 = vmul.f32 2.0, %v1135_v54  ;;  %v1137_v57 = vpop.eup %1136 }
 0xb3a   :  { %v654_v60 = vmul.f32 %v1137_v57, %v568_v35 }
 0xb3b   :  { %v1003_v56 = vadd.f32 -1.0, %v652_v55 }
 0xb3d   :  { %v655_v58 = vmul.f32 %v1137_v57, %v1003_v56 }
 0xb3f   :  { %657 = vrot.lane.b32.xlu0 %v655_v58, %s1243_s1 }
 0xb43   :  { %675 = vperm.xlu0 %1052, %v1006_v59  }
 0xbb1   :  { %v658_v61 = vpop.permute.xlu0 %657 }
 0xbb2   :  { %v660_v62 = vadd.f32 %v658_v61, %v654_v60 }
 0xbb4   :  { %v1004_v63 = vmul.f32 -2.0, %v660_v62 }
 0xbb6   :  { %v663_v7 = vmul.f32 1.442695, %v1004_v63 }
 0xbb8   :  { %1138 = vpow2.f32 %v663_v7 }
 0xbc2   :  { %v1139_v10 = vpop.eup %1138  ;;  %v676_v21 = vpop.permute.xlu0 %675 }
 0xbc3   :  { %v665_v11 = vadd.f32 1.0, %v1139_v10  ;;  %v678_v23 = vmul.f32 %v676_v21, %v1367_v15  ;;  %v679_v24 = vmul.f32 %v676_v21, %v1369_v17 }
 0xbc5   :  { %1140 = vrcp.f32 %v665_v11  ;;  %v680_v25 = vadd.f32 %v678_v23, %v1372_v20  ;;  %v681_v27 = vadd.f32 %v679_v24, %v1375_v22 }
 0xbcf   :  { %v1141_v12 = vpop.eup %1140 }
 0xbd0   :  { %v668_v13 = vmul.f32 2.0, %v1141_v12  ;;  %v1066_v12 = vld [vmem:[%s1526_s4] sm:$0xff]  }
 0xbd2   :  { %v1005_v14 = vadd.f32 -1.0, %v668_v13  ;;  %v1244_v13 = vmov 0.0  }
 0xbd3   :  { %1031 = vmatprep.subr.bf16.mxu0 %v1244_v13 }
 0xbd4   :  { %v670_v16 = vmul.f32 %v1135_v54, %v1005_v14  ;;  %v1067_v14 = vld [vmem:[%s1526_s4 + $0x8] sm:$0xff]  }
 0xbd6   :  { %v682_v18 = vpack.c.bf16 %v670_v16, %v670_v16  ;;  %v1068_v16 = vld [vmem:[%s1526_s4 + $0x10] sm:$0xff]  }
 0xbd8   :  { %684 = vrot.lane.b32.xlu1 %v682_v18, %s1243_s1  ;;  %v1069_v18 = vld [vmem:[%s1526_s4 + $0x18] sm:$0xff]  }
 0xc4a   :  { %v685_v19 = vpop.permute.xlu1 %684 }
 0xc4b   :  { %1007 = vmatmul.mubr.msk.bf16.vlgmr.msra.gmra.mrb[12].mxu0 %vm133_vm0, %v685_v19 }
 0xc4c   :  { %1039 = vmatprep.mubr.msk.bf16.mxu0 %vm1245_vm1, %v1244_v13  ;;  %1032 = vmatpush3.bf16.msra.mxu0 %v1066_v12 }
 0xc4d   :  { %1033 = vmatprep.subr.bf16.mxu0 %v1244_v13 }
 0xc50   :  { %1034 = vmatpush3.bf16.msra.mxu0 %v1067_v14 }
 0xc51   :  { %1035 = vmatprep.subr.bf16.mxu0 %v1244_v13 }
 0xc54   :  { %1036 = vmatpush3.bf16.msra.mxu0 %v1068_v16 }
 0xc55   :  { %1037 = vmatprep.subr.bf16.mxu0 %v1244_v13 }
 0xc58   :  { %1038 = vmatpush3.bf16.msra.mxu0 %v1069_v18 }
 0xd1e   :  { %v723_v26 = vpop.f32.mrb[12].mxu0 }
 0xd1f   :  { %v730_v28 = vadd.f32 %v723_v26, %v680_v25  ;;  %v725_v29 = vpop.f32.mrb[13].mxu0 }
 0xd20   :  { %v731_v30 = vadd.f32 %v725_v29, %v681_v27  ;;  %v727_v31 = vpop.f32.mrb[14].mxu0 }
 0xd21   :  { %v1008_v32 = vmul.f32 -1.442695, %v730_v28  ;;  %v728_v33 = vpop.f32.mrb[15].mxu0 }
 0xd22   :  { %v1009_v34 = vmul.f32 -1.442695, %v731_v30 }
 0xd23   :  { %1142 = vpow2.f32 %v1008_v32 }
 0xd24   :  { %1144 = vpow2.f32 %v1009_v34  ;;  %v1020_v34 = vld [vmem:[%s1527_s5] ss:$0 sm:$0xff] }
 0xd2d   :  { %v1143_v35 = vpop.eup %1142 }
 0xd2e   :  { %v1145_v36 = vpop.eup %1144  ;;  %v738_v38 = vadd.f32 1.0, %v1143_v35 }
 0xd2f   :  { %v739_v37 = vadd.f32 1.0, %v1145_v36 }
 0xd31   :  { %1146 = vrcp.f32 %v739_v37 }
 0xd32   :  { %1148 = vrcp.f32 %v738_v38 }
 0xd3b   :  { %v1147_v1 = vpop.eup %1146 }
 0xd3c   :  { %v744_v39 = vmul.f32 2.0, %v1147_v1  ;;  %v1149_v41 = vpop.eup %1148 }
 0xd3d   :  { %v746_v44 = vmul.f32 %v1149_v41, %v660_v62 }
 0xd3e   :  { %v1010_v40 = vadd.f32 -1.0, %v744_v39 }
 0xd40   :  { %v747_v42 = vmul.f32 %v1149_v41, %v1010_v40 }
 0xd42   :  { %749 = vrot.lane.b32.xlu1 %v747_v42, %s1243_s1 }
 0xd46   :  { %767 = vperm.xlu1 %1053, %v1013_v43  }
 0xdb4   :  { %v750_v45 = vpop.permute.xlu1 %749 }
 0xdb5   :  { %v752_v46 = vadd.f32 %v750_v45, %v746_v44 }
 0xdb7   :  { %v1011_v47 = vmul.f32 -2.0, %v752_v46 }
 0xdb9   :  { %v755_v2 = vmul.f32 1.442695, %v1011_v47 }
 0xdbb   :  { %1150 = vpow2.f32 %v755_v2 }
 0xdc5   :  { %v1151_v0 = vpop.eup %1150  ;;  %v768_v51 = vpop.permute.xlu1 %767 }
 0xdc6   :  { %v757_v3 = vadd.f32 1.0, %v1151_v0  ;;  %v770_v8 = vmul.f32 %v768_v51, %v1367_v15  ;;  %v771_v9 = vmul.f32 %v768_v51, %v1369_v17 }
 0xdc8   :  { %1152 = vrcp.f32 %v757_v3  ;;  %v772_v52 = vadd.f32 %v770_v8, %v1372_v20  ;;  %v773_v54 = vadd.f32 %v771_v9, %v1375_v22 }
 0xdd2   :  { %v1153_v48 = vpop.eup %1152 }
 0xdd3   :  { %v760_v4 = vmul.f32 2.0, %v1153_v48 }
 0xdd5   :  { %v1012_v49 = vadd.f32 -1.0, %v760_v4 }
 0xdd7   :  { %v762_v5 = vmul.f32 %v1147_v1, %v1012_v49 }
 0xdd9   :  { %v774_v50 = vpack.c.bf16 %v762_v5, %v762_v5 }
 0xddb   :  { %776 = vrot.lane.b32.xlu0 %v774_v50, %s1243_s1 }
 0xe4d   :  { %v777_v6 = vpop.permute.xlu0 %776 }
 0xe4e   :  { %1014 = vmatmul.mubr.msk.bf16.vlgmr.msra.gmra.mrb[12].mxu1 %vm133_vm0, %v777_v6 }
 0xf21   :  { %v815_v53 = vpop.f32.mrb[12].mxu1 }
 0xf22   :  { %v822_v55 = vadd.f32 %v815_v53, %v772_v52  ;;  %v817_v56 = vpop.f32.mrb[13].mxu1 }
 0xf23   :  { %v823_v57 = vadd.f32 %v817_v56, %v773_v54  ;;  %v819_v58 = vpop.f32.mrb[14].mxu1 }
 0xf24   :  { %v1015_v59 = vmul.f32 -1.442695, %v822_v55  ;;  %v820_v60 = vpop.f32.mrb[15].mxu1 }
 0xf25   :  { %v1016_v61 = vmul.f32 -1.442695, %v823_v57 }
 0xf26   :  { %1154 = vpow2.f32 %v1015_v59 }
 0xf27   :  { %1156 = vpow2.f32 %v1016_v61 }
 0xf30   :  { %v1155_v62 = vpop.eup %1154 }
 0xf31   :  { %v1157_v63 = vpop.eup %1156  ;;  %v830_v15 = vadd.f32 1.0, %v1155_v62 }
 0xf32   :  { %v831_v7 = vadd.f32 1.0, %v1157_v63 }
 0xf34   :  { %1158 = vrcp.f32 %v831_v7 }
 0xf35   :  { %1160 = vrcp.f32 %v830_v15 }
 0xf3e   :  { %v1159_v17 = vpop.eup %1158 }
 0xf3f   :  { %v836_v20 = vmul.f32 2.0, %v1159_v17  ;;  %v1161_v11 = vpop.eup %1160 }
 0xf40   :  { %v838_v19 = vmul.f32 %v1161_v11, %v752_v46 }
 0xf41   :  { %v1017_v10 = vadd.f32 -1.0, %v836_v20 }
 0xf43   :  { %v839_v22 = vmul.f32 %v1161_v11, %v1017_v10 }
 0xf45   :  { %841 = vrot.lane.b32.xlu0 %v839_v22, %s1243_s1 }
 0xfb7   :  { %v842_v21 = vpop.permute.xlu0 %841 }
 0xfb8   :  { %v844_v23 = vadd.f32 %v842_v21, %v838_v19 }
 0xfba   :  { %v1018_v24 = vmul.f32 -2.0, %v844_v23 }
 0xfbc   :  { %v847_v25 = vmul.f32 1.442695, %v1018_v24 }
 0xfbe   :  { %1162 = vpow2.f32 %v847_v25 }
 0xfc8   :  { %v1163_v26 = vpop.eup %1162 }
 0xfc9   :  { %v849_v27 = vadd.f32 1.0, %v1163_v26 }
 0xfcb   :  { %1164 = vrcp.f32 %v849_v27 }
 0xfd5   :  { %v1165_v28 = vpop.eup %1164 }
 0xfd6   :  { %v852_v29 = vmul.f32 2.0, %v1165_v28 }
 0xfd8   :  { %v1019_v30 = vadd.f32 -1.0, %v852_v29 }
 0xfda   :  { %v854_v31 = vmul.f32 %v1159_v17, %v1019_v30 }
 0xfdc   :  { %v855_v32 = vpack.c.bf16 %v854_v31, %v854_v31 }
 0xfde   :  { %872 = vrot.lane.b32.xlu1 %v855_v32, %s1243_s1 }
0x1050   :  { %v873_v33 = vpop.permute.xlu1 %872 }
0x1051   :  { %1040 = vmatmul.mubr.msk.bf16.vlgmr.msra.gmra.mrb[16].mxu0 %vm133_vm0, %v873_v33 }
0x1124   :  { %v935_v35 = vpop.f32.mrb[16].mxu0 }
0x1125   :  { %v936_v36 = vadd.f32 %v1020_v34, %v935_v35  ;;  %v1041_v37 = vpop.f32.mrb[17].mxu0 }
0x1126   :  { %v938_v38 = vpop.f32.mrb[18].mxu0 }
0x1127   :  { %941 = vst [vmem:[#allocation7] sm:$0x3] %v936_v36  ;;  %v1042_v1 = vpop.f32.mrb[19].mxu0 }
0x1128   :  { %1221 = shalt.err (!%p1218_p6)
}
0x1129   :  { %s1222_s5 = scalar_lea.hbm %s1528_s6, 32 }
0x112a   :  { %p1223_p7 = scmp.ne.s32.totalorder %s1528_s6, %s1222_s5  ;;  %p1226_p8 = scmp.lt.u32.totalorder %s1222_s5, %s1528_s6 }
0x112c   :  { %p1228_p9 = pnand %p1226_p8, %p1223_p7 }
0x112e   :  { %1231 = shalt.err (!%p1228_p9)
}
0x112f   :  { %951 = dma.vmem_to_hbm [thread:$0]  %s949_s22, 32, %s1528_s6, [#allocation4]  }
0x1130   :  { %1236 = dma.done.wait [#allocation4], 32  }
0x1131   :  { %1237 = vsyncadd [#allocation4], 4294967264 }
0x1132   :  { %955 = vsyncpa [#allocation3], 1 }
0x1133   :  { %956 = vsyncpa [#allocation6], 1 }
0x1134   :  { %957 = vsyncpa [#allocation4], 1 }

</bundles_post_ra>
